<compile_context>
chip_gen: v7x
topology: tpu7x:2x2x1
jax: 0.10.0
libtpu: 0.0.40
codegen_flags: <defaults>
</compile_context>

<pallas_src>
import functools

import jax
import jax.numpy as jnp
from jax.experimental import pallas as pl
from jax.experimental.pallas import tpu as pltpu

IN_FEATURES = 100
HID = 256
OUT = 784


def _round_up(n, m):
    return ((n + m - 1) // m) * m


def _default_tanh_bf16():
    """bf16 transcendentals are native on v6e/v7x; emulated (slow) elsewhere."""
    try:
        kind = jax.devices()[0].device_kind.lower()
        return any(t in kind for t in ("v6", "v7"))
    except Exception:
        return False


_DEFAULT_TANH_BF16 = _default_tanh_bf16()


def generator_kernel(x_ref, w1_ref, b1_ref, w2_ref, b2_ref, o_ref, *, tanh_bf16):
    # Linear 1: bf16 MXU operands (weights already bf16), f32 accumulation.
    h = jnp.dot(
        x_ref[...].astype(jnp.bfloat16),
        w1_ref[...],
        preferred_element_type=jnp.float32,
    )
    h = jnp.maximum(h + b1_ref[...], 0.0)          # bias + ReLU in f32 (VPU)
    # Dropout(p=0.1): identity in eval mode.
    # TODO(synk): training-mode dropout via pltpu.prng_seed/prng_random_bits.
    # Linear 2: bf16 MXU operands, f32 accumulation.
    y = jnp.dot(
        h.astype(jnp.bfloat16),
        w2_ref[...],
        preferred_element_type=jnp.float32,
    ) + b2_ref[...]
    if tanh_bf16:                                  # v6e/v7x: bf16 EUP tanh
        y = y.astype(jnp.bfloat16)
    o_ref[...] = jnp.tanh(y).astype(o_ref.dtype)


@functools.partial(jax.jit, static_argnames=("tm", "tanh_bf16", "out_dtype"))
def generator_forward(x, w1_bf16, b1, w2_bf16, b2,
                      tm=512, tanh_bf16=_DEFAULT_TANH_BF16,
                      out_dtype=jnp.float32):
    """x: (B, 100) float32 -> (B, 784) out_dtype (default float32)."""
    B = x.shape[0]

    # Batch tiling: pad only to a multiple of 8 and pick the tile so there is
    # minimal slack. For moderate batches use >= 2 tiles so v7x's two
    # TensorCores both get work (one extra grid step costs ~0.35 us elsewhere).
    b8 = _round_up(B, 8)
    n_tiles = pl.cdiv(b8, tm)
    if n_tiles == 1 and b8 >= 16:
        n_tiles = 2
    tm_eff = _round_up(pl.cdiv(b8, n_tiles), 8)
    b_pad = tm_eff * n_tiles

    x_p = x if b_pad == B else jnp.pad(x, ((0, b_pad - B), (0, 0)))

    out = pl.pallas_call(
        functools.partial(generator_kernel, tanh_bf16=tanh_bf16),
        out_shape=jax.ShapeDtypeStruct((b_pad, OUT), out_dtype),
        grid=(n_tiles,),
        in_specs=[
            # x tile: full (unpadded) 100-wide last dim is a legal block.
            pl.BlockSpec((tm_eff, IN_FEATURES), lambda i: (i, 0)),
            pl.BlockSpec((IN_FEATURES, HID), lambda i: (0, 0)),   # W1 (resident, bf16)
            pl.BlockSpec((1, HID), lambda i: (0, 0)),             # b1 (resident, f32)
            pl.BlockSpec((HID, OUT), lambda i: (0, 0)),           # W2 (resident, bf16)
            pl.BlockSpec((1, OUT), lambda i: (0, 0)),             # b2 (resident, f32)
        ],
        out_specs=pl.BlockSpec((tm_eff, OUT), lambda i: (i, 0)),
        compiler_params=pltpu.CompilerParams(
            dimension_semantics=("parallel",),   # v7x: shard tiles across 2 TCs
        ),
    )(x_p, w1_bf16, b1, w2_bf16, b2)

    return out if b_pad == B else out[:B]


def init_params(key):
    """Deterministic init mimicking PyTorch nn.Linear defaults:
    U(-1/sqrt(fan_in), 1/sqrt(fan_in)) for both weight and bias. f32 master."""
    k1, k2, k3, k4 = jax.random.split(key, 4)
    bound1 = 1.0 / (IN_FEATURES ** 0.5)
    bound2 = 1.0 / (HID ** 0.5)
    w1 = jax.random.uniform(k1, (IN_FEATURES, HID), jnp.float32, -bound1, bound1)
    b1 = jax.random.uniform(k2, (1, HID), jnp.float32, -bound1, bound1)
    w2 = jax.random.uniform(k3, (HID, OUT), jnp.float32, -bound2, bound2)
    b2 = jax.random.uniform(k4, (1, OUT), jnp.float32, -bound2, bound2)
    return w1, b1, w2, b2


def prepare_params(w1, b1, w2, b2):
    """One-time weight conversion, hoisted out of the per-call path:
    MXU operands in bf16 (halves weight DMA + resident VMEM), biases in f32."""
    return w1.astype(jnp.bfloat16), b1, w2.astype(jnp.bfloat16), b2


def reference_forward(x, w1, b1, w2, b2):
    h = jnp.maximum(x @ w1 + b1, 0.0)
    return jnp.tanh(h @ w2 + b2)


if __name__ == "__main__":
    key = jax.random.PRNGKey(0)
    kx, kp = jax.random.split(key)
    w1, b1, w2, b2 = init_params(kp)
    w1_bf16, b1_p, w2_bf16, b2_p = prepare_params(w1, b1, w2, b2)

    # Reference uses the same (bf16-rounded) weights, upcast to f32.
    w1_ref = w1_bf16.astype(jnp.float32)
    w2_ref = w2_bf16.astype(jnp.float32)

    # Small batch (single tile, no batch padding at all).
    batch = 8
    x = jax.random.normal(kx, (batch, IN_FEATURES), dtype=jnp.float32)
    out = jax.block_until_ready(generator_forward(x, w1_bf16, b1_p, w2_bf16, b2_p))
    ref = jax.block_until_ready(reference_forward(x, w1_ref, b1_p, w2_ref, b2_p))
    assert out.shape == (batch, OUT), out.shape
    # bf16 MXU operands (f32 accumulation) => loosened tolerance vs f32 ref.
    assert jnp.allclose(out, ref, atol=2e-2, rtol=2e-2), float(
        jnp.max(jnp.abs(out - ref)))

    # Larger, ragged batch (exercises the 2-tile grid + minimal batch padding:
    # 300 -> 304 rows, two 152-row tiles).
    batch2 = 300
    x2 = jax.random.normal(kx, (batch2, IN_FEATURES), dtype=jnp.float32)
    out2 = jax.block_until_ready(generator_forward(x2, w1_bf16, b1_p, w2_bf16, b2_p))
    ref2 = jax.block_until_ready(reference_forward(x2, w1_ref, b1_p, w2_ref, b2_p))
    assert out2.shape == (batch2, OUT), out2.shape
    assert jnp.allclose(out2, ref2, atol=2e-2, rtol=2e-2), float(
        jnp.max(jnp.abs(out2 - ref2)))

    print("KERNEL_OK")
</pallas_src>

<mosaic_0001>
module attributes {stable_mosaic.version = 11 : i64} {
  func.func @generator_kernel(%arg0: i32, %arg1: memref<8x100xf32, #tpu.memory_space<vmem>>, %arg2: memref<100x256xbf16, #tpu.memory_space<vmem>>, %arg3: memref<1x256xf32, #tpu.memory_space<vmem>>, %arg4: memref<256x784xbf16, #tpu.memory_space<vmem>>, %arg5: memref<1x784xf32, #tpu.memory_space<vmem>>, %arg6: memref<8x784xf32, #tpu.memory_space<vmem>>) attributes {dimension_semantics = [#tpu.dimension_semantics<parallel>], iteration_bounds = array<i64: 1>, scalar_prefetch = 0 : i64, scratch_operands = 0 : i64, tpu.core_type = #tpu.core_type<tc>, window_params = [{transform_indices = @transform_0, window_bounds = array<i64: 8, 100>}, {pipeline_mode = #tpu.pipeline_mode<synchronous>, transform_indices = @transform_1, window_bounds = array<i64: 100, 256>}, {pipeline_mode = #tpu.pipeline_mode<synchronous>, transform_indices = @transform_2, window_bounds = array<i64: 1, 256>}, {pipeline_mode = #tpu.pipeline_mode<synchronous>, transform_indices = @transform_3, window_bounds = array<i64: 256, 784>}, {pipeline_mode = #tpu.pipeline_mode<synchronous>, transform_indices = @transform_4, window_bounds = array<i64: 1, 784>}, {transform_indices = @transform_5, window_bounds = array<i64: 8, 784>}]} {
    %c0 = arith.constant 0 : index
    %c0_0 = arith.constant 0 : index
    %0 = vector.load %arg1[%c0, %c0_0] : memref<8x100xf32, #tpu.memory_space<vmem>>, vector<8x100xf32>
    %1 = arith.truncf %0 : vector<8x100xf32> to vector<8x100xbf16>
    %c0_1 = arith.constant 0 : index
    %c0_2 = arith.constant 0 : index
    %2 = vector.load %arg2[%c0_1, %c0_2] : memref<100x256xbf16, #tpu.memory_space<vmem>>, vector<100x256xbf16>
    %cst = arith.constant dense<0.000000e+00> : vector<8x256xf32>
    %3 = tpu.matmul %1, %2, %cst {dimension_numbers = #tpu.dot_dimension_numbers<[1], [0], [0], [1], [0, 0, 1, 1], [], []>} : vector<8x100xbf16>, vector<100x256xbf16>, vector<8x256xf32> -> vector<8x256xf32>
    %c0_3 = arith.constant 0 : index
    %c0_4 = arith.constant 0 : index
    %4 = vector.load %arg3[%c0_3, %c0_4] : memref<1x256xf32, #tpu.memory_space<vmem>>, vector<1x256xf32>
    %5 = vector.broadcast %4 : vector<1x256xf32> to vector<8x256xf32>
    %6 = arith.addf %3, %5 : vector<8x256xf32>
    %cst_5 = arith.constant 0.000000e+00 : f32
    %7 = vector.broadcast %cst_5 : f32 to vector<8x256xf32>
    %8 = arith.maximumf %6, %7 : vector<8x256xf32>
    %9 = arith.truncf %8 : vector<8x256xf32> to vector<8x256xbf16>
    %c0_6 = arith.constant 0 : index
    %c0_7 = arith.constant 0 : index
    %10 = vector.load %arg4[%c0_6, %c0_7] : memref<256x784xbf16, #tpu.memory_space<vmem>>, vector<256x784xbf16>
    %cst_8 = arith.constant dense<0.000000e+00> : vector<8x784xf32>
    %11 = tpu.matmul %9, %10, %cst_8 {dimension_numbers = #tpu.dot_dimension_numbers<[1], [0], [0], [1], [0, 0, 1, 1], [], []>} : vector<8x256xbf16>, vector<256x784xbf16>, vector<8x784xf32> -> vector<8x784xf32>
    %c0_9 = arith.constant 0 : index
    %c0_10 = arith.constant 0 : index
    %12 = vector.load %arg5[%c0_9, %c0_10] : memref<1x784xf32, #tpu.memory_space<vmem>>, vector<1x784xf32>
    %13 = vector.broadcast %12 : vector<1x784xf32> to vector<8x784xf32>
    %14 = arith.addf %11, %13 : vector<8x784xf32>
    %15 = math.tanh %14 : vector<8x784xf32>
    %c0_11 = arith.constant 0 : index
    %c0_12 = arith.constant 0 : index
    %16 = vector.load %arg6[%c0_11, %c0_12] : memref<8x784xf32, #tpu.memory_space<vmem>>, vector<8x784xf32>
    tpu.vector_store %arg6[%c0_11, %c0_12], %15 {strides = array<i32>} : memref<8x784xf32, #tpu.memory_space<vmem>>, vector<8x784xf32>,
    return
  }
  func.func @transform_0(%arg0: i32) -> (i32, i32) {
    %c0_i32 = arith.constant 0 : i32
    %c0_i32_0 = arith.constant 0 : i32
    return %arg0, %c0_i32 : i32, i32
  }
  func.func @transform_1(%arg0: i32) -> (i32, i32) {
    %c0_i32 = arith.constant 0 : i32
    %c0_i32_0 = arith.constant 0 : i32
    %c0_i32_1 = arith.constant 0 : i32
    return %c0_i32, %c0_i32_0 : i32, i32
  }
  func.func @transform_2(%arg0: i32) -> (i32, i32) {
    %c0_i32 = arith.constant 0 : i32
    %c0_i32_0 = arith.constant 0 : i32
    %c0_i32_1 = arith.constant 0 : i32
    return %c0_i32, %c0_i32_0 : i32, i32
  }
  func.func @transform_3(%arg0: i32) -> (i32, i32) {
    %c0_i32 = arith.constant 0 : i32
    %c0_i32_0 = arith.constant 0 : i32
    %c0_i32_1 = arith.constant 0 : i32
    return %c0_i32, %c0_i32_0 : i32, i32
  }
  func.func @transform_4(%arg0: i32) -> (i32, i32) {
    %c0_i32 = arith.constant 0 : i32
    %c0_i32_0 = arith.constant 0 : i32
    %c0_i32_1 = arith.constant 0 : i32
    return %c0_i32, %c0_i32_0 : i32, i32
  }
  func.func @transform_5(%arg0: i32) -> (i32, i32) {
    %c0_i32 = arith.constant 0 : i32
    %c0_i32_0 = arith.constant 0 : i32
    return %arg0, %c0_i32 : i32, i32
  }
}

</mosaic_0001>

<bundles_post_ra>
// kernel: generator_forward.1
= control target key start
LH: loop header
LB: loop body
LE: loop exit
PB: predicated region body
PF: predicated region fallthrough
CT: control target
= control target key end

     0   :  { %v1473_v2 = vmov 0   ;;  %vm118_vm0 = vcmask 1041408   ;;  %vm114_vm1 = vcmask 818176   ;;  %s1924_s0 = inlined_call_operand.vmem [shape: f32[8,100], index: 0, kind: input, shape index: {}]   ;;  %s1925_s1 = inlined_call_operand.vmem [shape: bf16[100,256], index: 1, kind: input, shape index: {}]   ;;  %s1926_s2 = inlined_call_operand.vmem [shape: f32[1,256], index: 2, kind: input, shape index: {}]   ;;  %s1927_s3 = inlined_call_operand.vmem [shape: bf16[256,784], index: 3, kind: input, shape index: {}]   ;;  %s1928_s4 = inlined_call_operand.vmem [shape: f32[1,784], index: 4, kind: input, shape index: {}]   ;;  %s1929_s5 = inlined_call_operand.hbm [shape: f32[8,784], index: 5, kind: output, shape index: {}]  }
   0x1   :  { %v1255_v0 = vld [vmem:[%s1925_s1 + $0x4] ss:$8 sps:$4 sm:$0xff]   ;;  %v1257_v1 = vld [vmem:[%s1925_s1] ss:$8 sps:$4 sm:$0xff]   ;;  %157 = vmatprep.mubr.bf16.mxu0 %v1473_v2  ;;  %v1258_v3 = vld [vmem:[%s1925_s1 + $0x14] ss:$8 sps:$4 sm:$0xff]  }
   0x2   :  { %125 = vmatprep.subr.bf16.mxu0 %v1255_v0  ;;  %v1260_v4 = vld [vmem:[%s1925_s1 + $0x10] ss:$8 sps:$4 sm:$0xff]   ;;  %v1261_v5 = vld [vmem:[%s1925_s1 + $0x24] ss:$8 sps:$4 sm:$0xff]   ;;  %v1263_v6 = vld [vmem:[%s1925_s1 + $0x20] ss:$8 sps:$4 sm:$0xff]  }
   0x3   :  { %126 = vmatpush1.bf16.msra.mxu0 %v1257_v1  ;;  %v1264_v7 = vld [vmem:[%s1925_s1 + $0x34] ss:$8 sps:$4 sm:$0xff]   ;;  %v1275_v8 = vld [vmem:[%s1927_s3 + $0x4] ss:$28 sps:$4 sm:$0xff]   ;;  %v1266_v9 = vld [vmem:[%s1925_s1 + $0x30] ss:$8 sps:$4 sm:$0xff]  }
   0x4   :  { %127 = vmatprep.subr.bf16.mxu0 %v1258_v3  ;;  %v1267_v10 = vld [vmem:[%s1925_s1 + $0x44] ss:$8 sps:$4 sm:$0xff]   ;;  %911 = vmatprep.subr.bf16.mxu1 %v1275_v8  ;;  %v1280_v11 = vld [vmem:[%s1927_s3] ss:$28 sps:$4 sm:$0xff]   ;;  %v1286_v13 = vld [vmem:[%s1927_s3 + $0x38] ss:$28 sps:$4 sm:$0xff]  }
   0x5   :  { %v1281_v12 = vld [vmem:[%s1927_s3 + $0x3c] ss:$28 sps:$4 sm:$0xff]   ;;  %912 = vmatpush1.bf16.msra.mxu1 %v1280_v11  ;;  %v1287_v14 = vld [vmem:[%s1927_s3 + $0x74] ss:$28 sps:$4 sm:$0xff]   ;;  %v1269_v15 = vld [vmem:[%s1925_s1 + $0x40] ss:$8 sps:$4 sm:$0xff]  }
   0x6   :  { %913 = vmatprep.subr.bf16.mxu1 %v1281_v12  ;;  %v1270_v16 = vld [vmem:[%s1925_s1 + $0x54] ss:$8 sps:$4 sm:$0xff]   ;;  %v36_v17 = vld [vmem:[%s1925_s1 + $0x60] sm:$0x33]  ;;  %v1292_v18 = vld [vmem:[%s1927_s3 + $0x70] ss:$28 sps:$4 sm:$0xff]  }
   0x7   :  { %128 = vmatpush1.bf16.msra.mxu0 %v1260_v4  ;;  %v1293_v19 = vld [vmem:[%s1927_s3 + $0xac] ss:$28 sps:$4 sm:$0xff]   ;;  %v1272_v20 = vld [vmem:[%s1925_s1 + $0x50] ss:$8 sps:$4 sm:$0xff]   ;;  %v1116_v21 = vcombine.high %v36_v17, %v36_v17  ;;  %v1115_v22 = vcombine.low %v36_v17, %v36_v17  ;;  %v1299_v24 = vld [vmem:[%s1927_s3 + $0xe4] ss:$28 sps:$4 sm:$0xff]  }
   0x8   :  { %129 = vmatprep.subr.bf16.mxu0 %v1261_v5  ;;  %v1298_v23 = vld [vmem:[%s1927_s3 + $0xa8] ss:$28 sps:$4 sm:$0xff]   ;;  %v1304_v28 = vld [vmem:[%s1927_s3 + $0xe0] ss:$28 sps:$4 sm:$0xff]   ;;  %v1310_v33 = vld [vmem:[%s1927_s3 + $0x118] ss:$28 sps:$4 sm:$0xff]  }
   0x9   :  { %914 = vmatpush1.bf16.msra.mxu1 %v1286_v13  ;;  %v22_v25 = vld [vmem:[%s1924_s0] sm:$0xff]  ;;  %v120_v26 = vsel %vm118_vm0, %v1115_v22, 0  ;;  %v1279_v27 = vld [vmem:[%s1927_s3 + $0xc] ss:$28 sps:$4 sm:$0xff]   ;;  %v1305_v30 = vld [vmem:[%s1927_s3 + $0x11c] ss:$28 sps:$4 sm:$0xff]  }
   0xa   :  { %915 = vmatprep.subr.bf16.mxu1 %v1287_v14  ;;  %v23_v29 = vpack.c.bf16 %v22_v25, %v22_v25  ;;  %v1277_v31 = vld [vmem:[%s1927_s3 + $0x8] ss:$28 sps:$4 sm:$0xff]   ;;  %v1311_v34 = vld [vmem:[%s1927_s3 + $0x154] ss:$28 sps:$4 sm:$0xff]   ;;  %v1283_v35 = vld [vmem:[%s1927_s3 + $0x40] ss:$28 sps:$4 sm:$0xff]  }
   0xb   :  { %130 = vmatpush1.bf16.msra.mxu0 %v1263_v6  ;;  %v1285_v32 = vld [vmem:[%s1927_s3 + $0x44] ss:$28 sps:$4 sm:$0xff]   ;;  %v1291_v36 = vld [vmem:[%s1927_s3 + $0x7c] ss:$28 sps:$4 sm:$0xff]   ;;  %v1316_v37 = vld [vmem:[%s1927_s3 + $0x150] ss:$28 sps:$4 sm:$0xff]  }
   0xc   :  { %131 = vmatprep.subr.bf16.mxu0 %v1264_v7  ;;  %v1317_v38 = vld [vmem:[%s1927_s3 + $0x18c] ss:$28 sps:$4 sm:$0xff]   ;;  %v1289_v39 = vld [vmem:[%s1927_s3 + $0x78] ss:$28 sps:$4 sm:$0xff]   ;;  %v1323_v42 = vld [vmem:[%s1927_s3 + $0x1c4] ss:$28 sps:$4 sm:$0xff]  }
   0xd   :  { %916 = vmatpush1.bf16.msra.mxu1 %v1292_v18  ;;  %v1297_v40 = vld [vmem:[%s1927_s3 + $0xb4] ss:$28 sps:$4 sm:$0xff]   ;;  %v1322_v41 = vld [vmem:[%s1927_s3 + $0x188] ss:$28 sps:$4 sm:$0xff]   ;;  %v1328_v45 = vld [vmem:[%s1927_s3 + $0x1c0] ss:$28 sps:$4 sm:$0xff]  }
   0xe   :  { %917 = vmatprep.subr.bf16.mxu1 %v1293_v19  ;;  %v1295_v43 = vld [vmem:[%s1927_s3 + $0xb0] ss:$28 sps:$4 sm:$0xff]   ;;  %v1329_v46 = vld [vmem:[%s1927_s3 + $0x1fc] ss:$28 sps:$4 sm:$0xff]   ;;  %v1301_v47 = vld [vmem:[%s1927_s3 + $0xe8] ss:$28 sps:$4 sm:$0xff]  }
   0xf   :  { %132 = vmatpush1.bf16.msra.mxu0 %v1266_v9  ;;  %v1303_v44 = vld [vmem:[%s1927_s3 + $0xec] ss:$28 sps:$4 sm:$0xff]   ;;  %v1309_v48 = vld [vmem:[%s1927_s3 + $0x124] ss:$28 sps:$4 sm:$0xff]   ;;  %v1334_v50 = vld [vmem:[%s1927_s3 + $0x1f8] ss:$28 sps:$4 sm:$0xff]  }
  0x10   :  { %133 = vmatprep.subr.bf16.mxu0 %v1267_v10  ;;  %v1307_v49 = vld [vmem:[%s1927_s3 + $0x120] ss:$28 sps:$4 sm:$0xff]   ;;  %v1335_v52 = vld [vmem:[%s1927_s3 + $0x234] ss:$28 sps:$4 sm:$0xff]   ;;  %v1341_v54 = vld [vmem:[%s1927_s3 + $0x26c] ss:$28 sps:$4 sm:$0xff]  }
  0x11   :  { %918 = vmatpush1.bf16.msra.mxu1 %v1298_v23  ;;  %v1315_v51 = vld [vmem:[%s1927_s3 + $0x15c] ss:$28 sps:$4 sm:$0xff]   ;;  %v1340_v53 = vld [vmem:[%s1927_s3 + $0x230] ss:$28 sps:$4 sm:$0xff]   ;;  %v1346_v57 = vld [vmem:[%s1927_s3 + $0x268] ss:$28 sps:$4 sm:$0xff]  }
  0x12   :  { %919 = vmatprep.subr.bf16.mxu1 %v1299_v24  ;;  %v1313_v55 = vld [vmem:[%s1927_s3 + $0x158] ss:$28 sps:$4 sm:$0xff]   ;;  %v1347_v58 = vld [vmem:[%s1927_s3 + $0x2a4] ss:$28 sps:$4 sm:$0xff]   ;;  %v1319_v59 = vld [vmem:[%s1927_s3 + $0x190] ss:$28 sps:$4 sm:$0xff]  }
  0x13   :  { %134 = vmatpush1.bf16.msra.mxu0 %v1269_v15  ;;  %v1321_v56 = vld [vmem:[%s1927_s3 + $0x194] ss:$28 sps:$4 sm:$0xff]   ;;  %v1327_v60 = vld [vmem:[%s1927_s3 + $0x1cc] ss:$28 sps:$4 sm:$0xff]   ;;  %v1352_v61 = vld [vmem:[%s1927_s3 + $0x2a0] ss:$28 sps:$4 sm:$0xff]  }
  0x14   :  { %135 = vmatprep.subr.bf16.mxu0 %v1270_v16  ;;  %v1353_v62 = vld [vmem:[%s1927_s3 + $0x2dc] ss:$28 sps:$4 sm:$0xff]   ;;  %v1325_v63 = vld [vmem:[%s1927_s3 + $0x1c8] ss:$28 sps:$4 sm:$0xff]   ;;  %v1345_v5 = vld [vmem:[%s1927_s3 + $0x274] ss:$28 sps:$4 sm:$0xff]  }
  0x15   :  { %920 = vmatpush1.bf16.msra.mxu1 %v1304_v28  ;;  %v1333_v0 = vld [vmem:[%s1927_s3 + $0x204] ss:$28 sps:$4 sm:$0xff]   ;;  %v1358_v1 = vld [vmem:[%s1927_s3 + $0x2d8] ss:$28 sps:$4 sm:$0xff]  }
  0x16   :  { %921 = vmatprep.subr.bf16.mxu1 %v1305_v30  ;;  %v1331_v2 = vld [vmem:[%s1927_s3 + $0x200] ss:$28 sps:$4 sm:$0xff]   ;;  %v1337_v4 = vld [vmem:[%s1927_s3 + $0x238] ss:$28 sps:$4 sm:$0xff]  }
  0x17   :  { %136 = vmatpush1.bf16.msra.mxu0 %v1272_v20  ;;  %v1339_v3 = vld [vmem:[%s1927_s3 + $0x23c] ss:$28 sps:$4 sm:$0xff]  }
  0x18   :  { %1117 = vmatprep.subr.msk.bf16.mxu0 %vm118_vm0, %v1116_v21 }
  0x19   :  { %922 = vmatpush1.bf16.msra.mxu1 %v1310_v33 }
  0x1a   :  { %923 = vmatprep.subr.bf16.mxu1 %v1311_v34 }
  0x1b   :  { %138 = vmatpush1.bf16.msra.mxu0 %v120_v26 }
  0x1c   :  { %952 = vmatprep.subr.bf16.mxu0 %v1279_v27 }
  0x1d   :  { %924 = vmatpush1.bf16.msra.mxu1 %v1316_v37 }
  0x1e   :  { %1118 = vmatmul.mubr.msk.bf16.vlgmr.msra.gmra.mrb[0].mxu0 %vm114_vm1, %v23_v29  ;;  %925 = vmatprep.subr.bf16.mxu1 %v1317_v38 }
  0x1f   :  { %953 = vmatpush1.bf16.msra.mxu0 %v1277_v31 }
  0x20   :  { %954 = vmatprep.subr.bf16.mxu0 %v1285_v32 }
  0x21   :  { %926 = vmatpush1.bf16.msra.mxu1 %v1322_v41 }
  0x22   :  { %927 = vmatprep.subr.bf16.mxu1 %v1323_v42 }
  0x23   :  { %955 = vmatpush1.bf16.msra.mxu0 %v1283_v35 }
  0x24   :  { %956 = vmatprep.subr.bf16.mxu0 %v1291_v36 }
  0x25   :  { %928 = vmatpush1.bf16.msra.mxu1 %v1328_v45 }
  0x26   :  { %929 = vmatprep.subr.bf16.mxu1 %v1329_v46 }
  0x27   :  { %957 = vmatpush1.bf16.msra.mxu0 %v1289_v39 }
  0x28   :  { %958 = vmatprep.subr.bf16.mxu0 %v1297_v40 }
  0x29   :  { %930 = vmatpush1.bf16.msra.mxu1 %v1334_v50 }
  0x2a   :  { %931 = vmatprep.subr.bf16.mxu1 %v1335_v52 }
  0x2b   :  { %959 = vmatpush1.bf16.msra.mxu0 %v1295_v43 }
  0x2c   :  { %960 = vmatprep.subr.bf16.mxu0 %v1303_v44 }
  0x2d   :  { %932 = vmatpush1.bf16.msra.mxu1 %v1340_v53 }
  0x2e   :  { %933 = vmatprep.subr.bf16.mxu1 %v1341_v54 }
  0x2f   :  { %961 = vmatpush1.bf16.msra.mxu0 %v1301_v47 }
  0x30   :  { %962 = vmatprep.subr.bf16.mxu0 %v1309_v48 }
  0x31   :  { %934 = vmatpush1.bf16.msra.mxu1 %v1346_v57 }
  0x32   :  { %935 = vmatprep.subr.bf16.mxu1 %v1347_v58 }
  0x33   :  { %963 = vmatpush1.bf16.msra.mxu0 %v1307_v49 }
  0x34   :  { %964 = vmatprep.subr.bf16.mxu0 %v1315_v51 }
  0x35   :  { %936 = vmatpush1.bf16.msra.mxu1 %v1352_v61 }
  0x36   :  { %937 = vmatprep.subr.bf16.mxu1 %v1353_v62 }
  0x37   :  { %965 = vmatpush1.bf16.msra.mxu0 %v1313_v55 }
  0x38   :  { %966 = vmatprep.subr.bf16.mxu0 %v1321_v56 }
  0x39   :  { %938 = vmatpush1.bf16.msra.mxu1 %v1358_v1 }
  0x3b   :  { %967 = vmatpush1.bf16.msra.mxu0 %v1319_v59 }
  0x3c   :  { %968 = vmatprep.subr.bf16.mxu0 %v1327_v60 }
  0x3f   :  { %969 = vmatpush1.bf16.msra.mxu0 %v1325_v63 }
  0x40   :  { %970 = vmatprep.subr.bf16.mxu0 %v1333_v0 }
  0x43   :  { %971 = vmatpush1.bf16.msra.mxu0 %v1331_v2 }
  0x44   :  { %972 = vmatprep.subr.bf16.mxu0 %v1339_v3 }
  0x45   :  { %10 = vsyncpa [#allocation3], 0  ;;  %v1343_v6 = vld [vmem:[%s1927_s3 + $0x270] ss:$28 sps:$4 sm:$0xff]   ;;  %v1349_v8 = vld [vmem:[%s1927_s3 + $0x2a8] ss:$28 sps:$4 sm:$0xff]   ;;  %v39_v21 = vlaneseq }
  0x46   :  { %v1351_v7 = vld [vmem:[%s1927_s3 + $0x2ac] ss:$28 sps:$4 sm:$0xff]   ;;  %v1357_v9 = vld [vmem:[%s1927_s3 + $0x2e4] ss:$28 sps:$4 sm:$0xff]   ;;  %v1359_v11 = vld [vmem:[%s1927_s3 + $0x314] ss:$28 sps:$4 sm:$0xff]  }
  0x47   :  { %973 = vmatpush1.bf16.msra.mxu0 %v1337_v4  ;;  %v1355_v10 = vld [vmem:[%s1927_s3 + $0x2e0] ss:$28 sps:$4 sm:$0xff]   ;;  %v1361_v13 = vld [vmem:[%s1927_s3 + $0x318] ss:$28 sps:$4 sm:$0xff]   ;;  %v1364_v14 = vld [vmem:[%s1927_s3 + $0x310] ss:$28 sps:$4 sm:$0xff]   ;;  %939 = vmatprep.subr.bf16.mxu1 %v1359_v11 }
  0x48   :  { %974 = vmatprep.subr.bf16.mxu0 %v1345_v5  ;;  %v1363_v12 = vld [vmem:[%s1927_s3 + $0x31c] ss:$28 sps:$4 sm:$0xff]   ;;  %940 = vmatpush1.bf16.msra.mxu1 %v1364_v14  ;;  %v1365_v15 = vld [vmem:[%s1927_s3 + $0x34c] ss:$28 sps:$4 sm:$0xff]   ;;  %v1369_v16 = vld [vmem:[%s1927_s3 + $0x354] ss:$28 sps:$4 sm:$0xff]  }
  0x49   :  { %v1367_v17 = vld [vmem:[%s1927_s3 + $0x350] ss:$28 sps:$4 sm:$0xff]   ;;  %v1370_v18 = vld [vmem:[%s1927_s3 + $0x348] ss:$28 sps:$4 sm:$0xff]   ;;  %941 = vmatprep.subr.bf16.mxu1 %v1365_v15  ;;  %v1374_v20 = vld [vmem:[%s1927_s3 + $0x1d8] ss:$28 sps:$4 sm:$0xff]  }
  0x4a   :  { %v1373_v19 = vld [vmem:[%s1927_s3 + $0x14] ss:$28 sps:$4 sm:$0xff]   ;;  %v1745_v22 = vshrl.u32 %v39_v21, 7  ;;  %v37_v24 = vld [vmem:[%s1926_s2] sm:$0x3]  ;;  %vm1087_vm2 = vcmask 130048  }
  0x4b   :  { %975 = vmatpush1.bf16.msra.mxu0 %v1343_v6  ;;  %v1371_v37 = vld [vmem:[%s1927_s3 + $0x10] ss:$28 sps:$4 sm:$0xff]   ;;  %v1375_v38 = vld [vmem:[%s1927_s3 + $0x18] ss:$28 sps:$4 sm:$0xff]   ;;  %v1376_v42 = vld [vmem:[%s1927_s3 + $0x48] ss:$28 sps:$4 sm:$0xff]  }
  0x4c   :  { %976 = vmatprep.subr.bf16.mxu0 %v1351_v7  ;;  %942 = vmatpush1.bf16.msra.mxu1 %v1370_v18  ;;  %v41_v23 = vsub.s32 0, %v1745_v22  ;;  %v45_v25 = vsub.s32 1, %v1745_v22  ;;  %v1378_v40 = vld [vmem:[%s1927_s3 + $0x4c] ss:$28 sps:$4 sm:$0xff]   ;;  %v1383_v44 = vld [vmem:[%s1927_s3 + $0x84] ss:$28 sps:$4 sm:$0xff]  }
  0x4d   :  { %993 = vmatprep.subr.bf16.mxu1 %v1373_v19  ;;  %v1379_v41 = vld [vmem:[%s1927_s3 + $0x210] ss:$28 sps:$4 sm:$0xff]   ;;  %v1384_v45 = vld [vmem:[%s1927_s3 + $0x248] ss:$28 sps:$4 sm:$0xff]   ;;  %v1381_v46 = vld [vmem:[%s1927_s3 + $0x80] ss:$28 sps:$4 sm:$0xff]  }
  0x4e   :  { %v42_v26 = vrot.slane %v37_v24, %v41_v23  ;;  %v46_v27 = vrot.slane %v37_v24, %v45_v25  ;;  %v1380_v43 = vld [vmem:[%s1927_s3 + $0x50] ss:$28 sps:$4 sm:$0xff]   ;;  %v1385_v47 = vld [vmem:[%s1927_s3 + $0x88] ss:$28 sps:$4 sm:$0xff]   ;;  %v1388_v48 = vld [vmem:[%s1927_s3 + $0xbc] ss:$28 sps:$4 sm:$0xff]  }
  0x4f   :  { %977 = vmatpush1.bf16.msra.mxu0 %v1349_v8  ;;  %v1389_v49 = vld [vmem:[%s1927_s3 + $0x280] ss:$28 sps:$4 sm:$0xff]   ;;  %v1386_v50 = vld [vmem:[%s1927_s3 + $0xb8] ss:$28 sps:$4 sm:$0xff]   ;;  %v1391_v54 = vld [vmem:[%s1927_s3 + $0xf0] ss:$28 sps:$4 sm:$0xff]  }
  0x50   :  { %978 = vmatprep.subr.bf16.mxu0 %v1357_v9  ;;  %v1390_v51 = vld [vmem:[%s1927_s3 + $0xc0] ss:$28 sps:$4 sm:$0xff]   ;;  %v1393_v52 = vld [vmem:[%s1927_s3 + $0xf4] ss:$28 sps:$4 sm:$0xff]   ;;  %v1398_v56 = vld [vmem:[%s1927_s3 + $0x12c] ss:$28 sps:$4 sm:$0xff]  }
  0x51   :  { %v1394_v53 = vld [vmem:[%s1927_s3 + $0x2b8] ss:$28 sps:$4 sm:$0xff]   ;;  %v1399_v57 = vld [vmem:[%s1927_s3 + $0x2f0] ss:$28 sps:$4 sm:$0xff]   ;;  %v1396_v58 = vld [vmem:[%s1927_s3 + $0x128] ss:$28 sps:$4 sm:$0xff]  }
  0x52   :  { %v1395_v55 = vld [vmem:[%s1927_s3 + $0xf8] ss:$28 sps:$4 sm:$0xff]   ;;  %v1400_v59 = vld [vmem:[%s1927_s3 + $0x130] ss:$28 sps:$4 sm:$0xff]   ;;  %v1403_v60 = vld [vmem:[%s1927_s3 + $0x164] ss:$28 sps:$4 sm:$0xff]  }
  0x53   :  { %979 = vmatpush1.bf16.msra.mxu0 %v1355_v10  ;;  %v1404_v61 = vld [vmem:[%s1927_s3 + $0x328] ss:$28 sps:$4 sm:$0xff]   ;;  %v1401_v62 = vld [vmem:[%s1927_s3 + $0x160] ss:$28 sps:$4 sm:$0xff]   ;;  %v1406_v2 = vld [vmem:[%s1927_s3 + $0x198] ss:$28 sps:$4 sm:$0xff]  }
  0x54   :  { %980 = vmatprep.subr.bf16.mxu0 %v1363_v12  ;;  %v1405_v63 = vld [vmem:[%s1927_s3 + $0x168] ss:$28 sps:$4 sm:$0xff]   ;;  %v1408_v0 = vld [vmem:[%s1927_s3 + $0x19c] ss:$28 sps:$4 sm:$0xff]   ;;  %v1413_v4 = vld [vmem:[%s1927_s3 + $0x1d4] ss:$28 sps:$4 sm:$0xff]  }
  0x55   :  { %v1409_v1 = vld [vmem:[%s1927_s3 + $0x360] ss:$28 sps:$4 sm:$0xff]   ;;  %v1411_v5 = vld [vmem:[%s1927_s3 + $0x1d0] ss:$28 sps:$4 sm:$0xff]   ;;  %v1414_v7 = vld [vmem:[%s1927_s3 + $0x208] ss:$28 sps:$4 sm:$0xff]  }
  0x56   :  { %v1410_v3 = vld [vmem:[%s1927_s3 + $0x1a0] ss:$28 sps:$4 sm:$0xff]   ;;  %v1416_v6 = vld [vmem:[%s1927_s3 + $0x20c] ss:$28 sps:$4 sm:$0xff]   ;;  %v1420_v11 = vld [vmem:[%s1927_s3 + $0x278] ss:$28 sps:$4 sm:$0xff]  }
  0x57   :  { %981 = vmatpush1.bf16.msra.mxu0 %v1361_v13  ;;  %v1419_v8 = vld [vmem:[%s1927_s3 + $0x244] ss:$28 sps:$4 sm:$0xff]   ;;  %v1422_v10 = vld [vmem:[%s1927_s3 + $0x27c] ss:$28 sps:$4 sm:$0xff]   ;;  %v1425_v12 = vld [vmem:[%s1927_s3 + $0x2b4] ss:$28 sps:$4 sm:$0xff]  }
  0x58   :  { %982 = vmatprep.subr.bf16.mxu0 %v1369_v16  ;;  %v1417_v9 = vld [vmem:[%s1927_s3 + $0x240] ss:$28 sps:$4 sm:$0xff]   ;;  %v1423_v13 = vld [vmem:[%s1927_s3 + $0x2b0] ss:$28 sps:$4 sm:$0xff]   ;;  %v1426_v15 = vld [vmem:[%s1927_s3 + $0x2e8] ss:$28 sps:$4 sm:$0xff]  }
  0x59   :  { %v1428_v14 = vld [vmem:[%s1927_s3 + $0x2ec] ss:$28 sps:$4 sm:$0xff]   ;;  %v1431_v16 = vld [vmem:[%s1927_s3 + $0x324] ss:$28 sps:$4 sm:$0xff]   ;;  %v1434_v18 = vld [vmem:[%s1927_s3 + $0x35c] ss:$28 sps:$4 sm:$0xff]  }
  0x5a   :  { %v1432_v19 = vld [vmem:[%s1927_s3 + $0x358] ss:$28 sps:$4 sm:$0xff]   ;;  %v298_v21 = vld [vmem:[%s1928_s4] sm:$0x7f]  ;;  %v314_v24 = vsub.s32 3, %v1745_v22 }
  0x5b   :  { %983 = vmatpush1.bf16.msra.mxu0 %v1367_v17  ;;  %v1429_v17 = vld [vmem:[%s1927_s3 + $0x320] ss:$28 sps:$4 sm:$0xff]   ;;  %s1474_s3 = smov [#allocation2]  }
  0x5c   :  { %1231 = vmatprep.subr.bf16.mxu0 %v1374_v20  ;;  %v310_v20 = vsub.s32 2, %v1745_v22  ;;  %s1095_s4 = sshll.u32 %s1474_s3, 4  ;;  %s1096_s4 = int_to_ptr.vmem [resolvable:$true] %s1095_s4 }
  0x5d   :  { %s1449_s29 = scalar_lea.vmem %s1096_s4, 896  ;;  %p1454_p1 = scmp.lt.s32.totalorder %s1096_s4, %s1096_s4 }
  0x5e   :  { %p1450_p0 = scmp.ne.s32.totalorder %s1096_s4, %s1449_s29  ;;  %p1455_p2 = scmp.lt.s32.totalorder %s1449_s29, %s1449_s29 }
  0x60   :  { %p1456_p3 = por %p1455_p2, %p1454_p1 }
  0x62   :  { %p1457_p4 = pnand %p1456_p3, %p1450_p0 }
  0xf1   :  { %v159_v28 = vpop.f32.mrb[0].mxu0 }
  0xf2   :  { %v160_v29 = vadd.f32 %v159_v28, %v42_v26  ;;  %v161_v30 = vpop.f32.mrb[1].mxu0  ;;  %v303_v26 = vrot.slane %v298_v21, %v41_v23  ;;  %v307_v28 = vrot.slane %v298_v21, %v45_v25 }
  0xf3   :  { %v162_v31 = vadd.f32 %v161_v30, %v46_v27  ;;  %v163_v32 = vpop.f32.mrb[2].mxu0  ;;  %v311_v27 = vrot.slane %v298_v21, %v310_v20 }
  0xf4   :  { %v166_v33 = vmax.f32 %v160_v29, 0.0  ;;  %v164_v34 = vpop.f32.mrb[3].mxu0  ;;  %v315_v29 = vrot.slane %v298_v21, %v314_v24 }
  0xf5   :  { %v167_v35 = vmax.f32 %v162_v31, 0.0 }
  0xf6   :  { %v1762_v39 = vpack.c.bf16 %v166_v33, %v166_v33 }
  0xf7   :  { %v169_v36 = vpack.c.bf16 %v167_v35, %v167_v35 }
  0xf9   :  { %943 = vmatprep.mubr.bf16.mxu1 %v169_v36  ;;  %984 = vmatprep.mubr.bf16.mxu0 %v169_v36 }
  0xfa   :  { %944 = vmatmul.mubr.bf16.vlgmr.msra.gmra.mrb[0].mxu1 %v1762_v39  ;;  %985 = vmatmul.mubr.bf16.vlgmr.msra.gmra.mrb[4].mxu0 %v1762_v39 }
  0xfb   :  { %994 = vmatpush1.bf16.msra.mxu1 %v1371_v37  ;;  %1232 = vmatpush3.bf16.msra.mxu0 %v1375_v38 }
  0xfc   :  { %1025 = vmatprep.mubr.bf16.mxu1 %v169_v36  ;;  %1066 = vmatprep.mubr.bf16.mxu0 %v169_v36 }
  0xfd   :  { %995 = vmatprep.subr.bf16.mxu1 %v1378_v40  ;;  %1233 = vmatprep.subr.bf16.mxu0 %v1379_v41 }
  0xff   :  { %996 = vmatpush1.bf16.msra.mxu1 %v1376_v42  ;;  %1234 = vmatpush3.bf16.msra.mxu0 %v1380_v43 }
 0x100   :  { %997 = vmatprep.subr.bf16.mxu1 %v1383_v44  ;;  %1235 = vmatprep.subr.bf16.mxu0 %v1384_v45  ;;  %v326_v44 = vsub.s32 6, %v1745_v22 }
 0x103   :  { %998 = vmatpush1.bf16.msra.mxu1 %v1381_v46  ;;  %1236 = vmatpush3.bf16.msra.mxu0 %v1385_v47  ;;  %v327_v46 = vrot.slane %v298_v21, %v326_v44 }
 0x104   :  { %999 = vmatprep.subr.bf16.mxu1 %v1388_v48  ;;  %1237 = vmatprep.subr.bf16.mxu0 %v1389_v49 }
 0x107   :  { %1000 = vmatpush1.bf16.msra.mxu1 %v1386_v50  ;;  %1238 = vmatpush3.bf16.msra.mxu0 %v1390_v51 }
 0x108   :  { %1001 = vmatprep.subr.bf16.mxu1 %v1393_v52  ;;  %1239 = vmatprep.subr.bf16.mxu0 %v1394_v53  ;;  %v318_v53 = vsub.s32 4, %v1745_v22 }
 0x10b   :  { %1002 = vmatpush1.bf16.msra.mxu1 %v1391_v54  ;;  %1240 = vmatpush3.bf16.msra.mxu0 %v1395_v55  ;;  %v322_v54 = vsub.s32 5, %v1745_v22  ;;  %v319_v55 = vrot.slane %v298_v21, %v318_v53 }
 0x10c   :  { %1003 = vmatprep.subr.bf16.mxu1 %v1398_v56  ;;  %1241 = vmatprep.subr.bf16.mxu0 %v1399_v57 }
 0x10d   :  { %v323_v56 = vrot.slane %v298_v21, %v322_v54 }
 0x10f   :  { %1004 = vmatpush1.bf16.msra.mxu1 %v1396_v58  ;;  %1242 = vmatpush3.bf16.msra.mxu0 %v1400_v59 }
 0x110   :  { %1005 = vmatprep.subr.bf16.mxu1 %v1403_v60  ;;  %1243 = vmatprep.subr.bf16.mxu0 %v1404_v61 }
 0x113   :  { %1006 = vmatpush1.bf16.msra.mxu1 %v1401_v62  ;;  %1244 = vmatpush3.bf16.msra.mxu0 %v1405_v63 }
 0x114   :  { %1007 = vmatprep.subr.bf16.mxu1 %v1408_v0  ;;  %1245 = vmatprep.subr.bf16.mxu0 %v1409_v1 }
 0x117   :  { %1008 = vmatpush1.bf16.msra.mxu1 %v1406_v2  ;;  %1246 = vmatpush3.bf16.msra.mxu0 %v1410_v3 }
 0x118   :  { %1009 = vmatprep.subr.bf16.mxu1 %v1413_v4 }
 0x11a   :  { %1067 = vmatmul.mubr.bf16.vlgmr.msra.gmra.mrb[8].mxu0 %v1762_v39 }
 0x11b   :  { %1010 = vmatpush1.bf16.msra.mxu1 %v1411_v5 }
 0x11c   :  { %1011 = vmatprep.subr.bf16.mxu1 %v1416_v6 }
 0x11f   :  { %1012 = vmatpush1.bf16.msra.mxu1 %v1414_v7 }
 0x120   :  { %1013 = vmatprep.subr.bf16.mxu1 %v1419_v8 }
 0x123   :  { %1014 = vmatpush1.bf16.msra.mxu1 %v1417_v9 }
 0x124   :  { %1015 = vmatprep.subr.bf16.mxu1 %v1422_v10 }
 0x127   :  { %1016 = vmatpush1.bf16.msra.mxu1 %v1420_v11 }
 0x128   :  { %1017 = vmatprep.subr.bf16.mxu1 %v1425_v12 }
 0x12b   :  { %1018 = vmatpush1.bf16.msra.mxu1 %v1423_v13 }
 0x12c   :  { %1019 = vmatprep.subr.bf16.mxu1 %v1428_v14 }
 0x12f   :  { %1020 = vmatpush1.bf16.msra.mxu1 %v1426_v15 }
 0x130   :  { %1021 = vmatprep.subr.bf16.mxu1 %v1431_v16 }
 0x133   :  { %1022 = vmatpush1.bf16.msra.mxu1 %v1429_v17 }
 0x134   :  { %1023 = vmatprep.subr.bf16.mxu1 %v1434_v18 }
 0x137   :  { %1024 = vmatpush1.bf16.msra.mxu1 %v1432_v19 }
 0x13a   :  { %1026 = vmatmul.mubr.bf16.vlgmr.msra.gmra.mrb[4].mxu1 %v1762_v39 }
 0x1cd   :  { %v945_v30 = vpop.f32.mrb[0].mxu1  ;;  %v986_v31 = vpop.f32.mrb[4].mxu0 }
 0x1ce   :  { %v946_v32 = vadd.f32 %v945_v30, %v303_v26  ;;  %v987_v33 = vadd.f32 %v986_v31, %v311_v27  ;;  %v947_v34 = vpop.f32.mrb[1].mxu1  ;;  %v988_v35 = vpop.f32.mrb[5].mxu0 }
 0x1cf   :  { %v948_v36 = vadd.f32 %v947_v34, %v307_v28  ;;  %v989_v37 = vadd.f32 %v988_v35, %v315_v29  ;;  %v949_v38 = vpop.f32.mrb[2].mxu1  ;;  %v990_v39 = vpop.f32.mrb[6].mxu0 }
 0x1d0   :  { %1435 = vtanh.f32 %v946_v32  ;;  %v950_v40 = vpop.f32.mrb[3].mxu1  ;;  %v991_v41 = vpop.f32.mrb[7].mxu0 }
 0x1d1   :  { %1437 = vtanh.f32 %v987_v33 }
 0x1d2   :  { %1439 = vtanh.f32 %v948_v36 }
 0x1d3   :  { %1441 = vtanh.f32 %v989_v37 }
 0x1da   :  { %v1436_v23 = vpop.eup %1435 }
 0x1db   :  { %v1438_v42 = vpop.eup %1437  ;;  %1081 = vst [vmem:[#allocation2] sm:$0xff] %v1436_v23 }
 0x1dc   :  { %v1440_v25 = vpop.eup %1439  ;;  %1083 = vst [vmem:[#allocation2 + $0x10] sm:$0xff] %v1438_v42 }
 0x1dd   :  { %v1442_v43 = vpop.eup %1441  ;;  %1082 = vst [vmem:[#allocation2 + $0x8] sm:$0xff] %v1440_v25 }
 0x1de   :  { %1084 = vst [vmem:[#allocation2 + $0x18] sm:$0xff] %v1442_v43 }
 0x1ed   :  { %v1247_v45 = vpop.f32.mrb[8].mxu0 }
 0x1ee   :  { %v1248_v47 = vpop.f32.mrb[9].mxu0 }
 0x1ef   :  { %v1249_v48 = vadd.f32 %v1248_v47, %v1247_v45  ;;  %v1250_v49 = vpop.f32.mrb[10].mxu0 }
 0x1f0   :  { %v1251_v50 = vpop.f32.mrb[11].mxu0 }
 0x1f1   :  { %v1069_v51 = vadd.f32 %v1249_v48, %v327_v46 }
 0x1f3   :  { %1443 = vtanh.f32 %v1069_v51 }
 0x1fd   :  { %v1444_v52 = vpop.eup %1443 }
 0x1fe   :  { %1088 = vst.msk [vmem:[#allocation2 + $0x30] sm:$0xff] %vm1087_vm2, %v1444_v52 }
 0x20d   :  { %v1027_v57 = vpop.f32.mrb[4].mxu1 }
 0x20e   :  { %v1028_v58 = vadd.f32 %v1027_v57, %v319_v55  ;;  %v1029_v59 = vpop.f32.mrb[5].mxu1 }
 0x20f   :  { %v1030_v60 = vadd.f32 %v1029_v59, %v323_v56  ;;  %v1031_v61 = vpop.f32.mrb[6].mxu1 }
 0x210   :  { %1445 = vtanh.f32 %v1028_v58  ;;  %v1032_v62 = vpop.f32.mrb[7].mxu1 }
 0x211   :  { %1447 = vtanh.f32 %v1030_v60 }
 0x21a   :  { %v1446_v63 = vpop.eup %1445 }
 0x21b   :  { %v1448_v0 = vpop.eup %1447  ;;  %1085 = vst [vmem:[#allocation2 + $0x20] sm:$0xff] %v1446_v63 }
 0x21c   :  { %1086 = vst [vmem:[#allocation2 + $0x28] sm:$0xff] %v1448_v0 }
 0x21d   :  { %1460 = shalt.err (!%p1457_p4)
}
 0x21e   :  { %s1461_s7 = scalar_lea.hbm %s1929_s5, 896 }
 0x21f   :  { %p1462_p5 = scmp.ne.s32.totalorder %s1929_s5, %s1461_s7  ;;  %p1465_p6 = scmp.lt.u32.totalorder %s1461_s7, %s1929_s5 }
 0x221   :  { %p1467_p7 = pnand %p1465_p6, %p1462_p5 }
 0x223   :  { %1470 = shalt.err (!%p1467_p7)
}
 0x224   :  { %1098 = dma.vmem_to_hbm [thread:$0]  %s1096_s4, 896, %s1929_s5, [#allocation3]  }
 0x225   :  { %1471 = dma.done.wait [#allocation3], 896  }
 0x226   :  { %1472 = vsyncadd [#allocation3], 4294966400 }
 0x227   :  { %1102 = vsyncpa [#allocation3], 1 }

</bundles_post_ra>
